<compile_context>
chip_gen: v7x
topology: tpu7x:2x2x1
jax: 0.10.0
libtpu: 0.0.40
codegen_flags: <defaults>
</compile_context>

<pallas_src>
import jax
import jax.numpy as jnp
from jax.experimental import pallas as pl
from jax.experimental.pallas import tpu as pltpu

# Row offsets (all multiples of 8 so slice loads stay sublane-aligned) of each
# parameter inside the packed (200, 50) buffer.  Columns always start at 0.
_W1_R, _W2_R, _W3_R, _W4_R = 0, 16, 72, 88       # w1:(15,1) w2:(50,15) w3:(10,50) w4:(10,1)
_B1_R, _B2_R, _B3_R, _B4_R = 104, 120, 176, 192  # b1:(15,1) b2:(50,1)  b3:(10,1)  b4:(1,1)
_PACK_ROWS, _PACK_COLS = 200, 50


def mlp_kernel(x_ref, p_ref, o_ref):
    x = x_ref[...]                                         # (1, N), batch along lanes

    # fc1 (1 -> 15) + ReLU.  K=1 contraction == outer product -> keep it on the
    # VPU as a broadcast multiply-add instead of a degenerate MXU matmul.
    w1 = p_ref[_W1_R:_W1_R + 15, 0:1]                      # (15, 1)
    b1 = p_ref[_B1_R:_B1_R + 15, 0:1]                      # (15, 1)
    h = jnp.maximum(w1 * x + b1, 0.0)                      # (15, N)

    # fc2 (15 -> 50), no activation (matches the PyTorch forward).  MXU.
    w2 = p_ref[_W2_R:_W2_R + 50, 0:15]                     # (50, 15)
    b2 = p_ref[_B2_R:_B2_R + 50, 0:1]                      # (50, 1)
    h = jnp.dot(w2, h, preferred_element_type=jnp.float32) + b2   # (50, N)

    # fc3 (50 -> 10) + ReLU.  MXU.
    w3 = p_ref[_W3_R:_W3_R + 10, 0:50]                     # (10, 50)
    b3 = p_ref[_B3_R:_B3_R + 10, 0:1]                      # (10, 1)
    h = jnp.maximum(
        jnp.dot(w3, h, preferred_element_type=jnp.float32) + b3, 0.0)  # (10, N)

    # fc4 (10 -> 1).  N=1 MXU output lane is pure latency -> VPU multiply plus
    # a small sublane reduction instead.
    w4 = p_ref[_W4_R:_W4_R + 10, 0:1]                      # (10, 1), stored as a column
    b4 = p_ref[_B4_R:_B4_R + 1, 0:1]                       # (1, 1)
    out = jnp.sum(w4 * h, axis=0, keepdims=True) + b4      # (1, N), lane-dense
    o_ref[...] = out


def pack_params(p):
    """Pack w1..w4 / b1..b4 (PyTorch layout: W=(out,in), b=(out,)) into one buffer."""
    buf = jnp.zeros((_PACK_ROWS, _PACK_COLS), jnp.float32)

    def put(b, r0, arr):
        rows, cols = arr.shape
        return b.at[r0:r0 + rows, 0:cols].set(arr)

    buf = put(buf, _W1_R, p["w1"])              # (15, 1)
    buf = put(buf, _W2_R, p["w2"])              # (50, 15)
    buf = put(buf, _W3_R, p["w3"])              # (10, 50)
    buf = put(buf, _W4_R, p["w4"].T)            # (10, 1)  column layout for VPU reduce
    buf = put(buf, _B1_R, p["b1"][:, None])     # (15, 1)
    buf = put(buf, _B2_R, p["b2"][:, None])     # (50, 1)
    buf = put(buf, _B3_R, p["b3"][:, None])     # (10, 1)
    buf = put(buf, _B4_R, p["b4"][:, None])     # (1, 1)
    return buf


def net_forward(x, params):
    """x: (N, 1) f32.  params: PyTorch-layout dict of w1..w4 (out,in), b1..b4 (out,)."""
    n = x.shape[0]
    x_lane = x.reshape(1, n)                    # batch along lanes
    packed = pack_params(params)

    vmem = pl.BlockSpec(memory_space=pltpu.MemorySpace.VMEM)
    flops = 2 * n * (1 * 15 + 15 * 50 + 50 * 10 + 10 * 1)
    bytes_accessed = 4 * (n + _PACK_ROWS * _PACK_COLS + n)

    out_lane = pl.pallas_call(
        mlp_kernel,
        out_shape=jax.ShapeDtypeStruct((1, n), jnp.float32),
        in_specs=[vmem, vmem],
        out_specs=vmem,
        cost_estimate=pl.CostEstimate(
            flops=flops, transcendentals=0, bytes_accessed=bytes_accessed),
    )(x_lane, packed)
    return out_lane.reshape(n, 1)


def init_params(key):
    """PyTorch nn.Linear-style init: W ~ U(-1/sqrt(fan_in), +), shape (out, in)."""
    dims = [(1, 15), (15, 50), (50, 10), (10, 1)]
    params = {}
    for idx, (fan_in, fan_out) in enumerate(dims, start=1):
        key, kw, kb = jax.random.split(key, 3)
        bound = 1.0 / jnp.sqrt(jnp.float32(fan_in))
        params[f"w{idx}"] = jax.random.uniform(
            kw, (fan_out, fan_in), jnp.float32, minval=-bound, maxval=bound)
        params[f"b{idx}"] = jax.random.uniform(
            kb, (fan_out,), jnp.float32, minval=-bound, maxval=bound)
    return params


def reference_forward(x, p):
    h = jnp.maximum(x @ p["w1"].T + p["b1"], 0.0)
    h = h @ p["w2"].T + p["b2"]
    h = jnp.maximum(h @ p["w3"].T + p["b3"], 0.0)
    return h @ p["w4"].T + p["b4"]


if __name__ == "__main__":
    key = jax.random.PRNGKey(0)
    params = init_params(key)

    # Same input as the original script: 200 points in [-1, 1], shape (200, 1).
    x = jnp.linspace(-1.0, 1.0, 200, dtype=jnp.float32)[:, None]

    out = jax.block_until_ready(net_forward(x, params))
    ref = reference_forward(x, params)

    assert out.shape == (200, 1), out.shape
    assert jnp.allclose(out, ref, atol=1e-5, rtol=1e-5), "mismatch vs pure-JAX reference"

    print("KERNEL_OK")
</pallas_src>

<mosaic_0001>
module attributes {stable_mosaic.version = 11 : i64} {
  func.func @mlp_kernel(%arg0: memref<1x200xf32, #tpu.memory_space<vmem>>, %arg1: memref<200x50xf32, #tpu.memory_space<vmem>>, %arg2: memref<1x200xf32, #tpu.memory_space<vmem>>) attributes {dimension_semantics = [], scalar_prefetch = 0 : i64, scratch_operands = 0 : i64, tpu.core_type = #tpu.core_type<tc>} {
    %c0 = arith.constant 0 : index
    %c0_0 = arith.constant 0 : index
    %0 = vector.load %arg0[%c0, %c0_0] : memref<1x200xf32, #tpu.memory_space<vmem>>, vector<1x200xf32>
    %c0_1 = arith.constant 0 : index
    %c0_2 = arith.constant 0 : index
    %1 = vector.load %arg1[%c0_1, %c0_2] : memref<200x50xf32, #tpu.memory_space<vmem>>, vector<15x1xf32>
    %c104 = arith.constant 104 : index
    %c0_3 = arith.constant 0 : index
    %2 = vector.load %arg1[%c104, %c0_3] : memref<200x50xf32, #tpu.memory_space<vmem>>, vector<15x1xf32>
    %3 = vector.broadcast %1 : vector<15x1xf32> to vector<15x200xf32>
    %4 = vector.broadcast %0 : vector<1x200xf32> to vector<15x200xf32>
    %5 = arith.mulf %3, %4 : vector<15x200xf32>
    %6 = vector.broadcast %2 : vector<15x1xf32> to vector<15x200xf32>
    %7 = arith.addf %5, %6 : vector<15x200xf32>
    %cst = arith.constant 0.000000e+00 : f32
    %8 = vector.broadcast %cst : f32 to vector<15x200xf32>
    %9 = arith.maximumf %7, %8 : vector<15x200xf32>
    %c16 = arith.constant 16 : index
    %c0_4 = arith.constant 0 : index
    %10 = vector.load %arg1[%c16, %c0_4] : memref<200x50xf32, #tpu.memory_space<vmem>>, vector<50x15xf32>
    %c120 = arith.constant 120 : index
    %c0_5 = arith.constant 0 : index
    %11 = vector.load %arg1[%c120, %c0_5] : memref<200x50xf32, #tpu.memory_space<vmem>>, vector<50x1xf32>
    %cst_6 = arith.constant dense<0.000000e+00> : vector<50x200xf32>
    %12 = tpu.matmul %10, %9, %cst_6 {dimension_numbers = #tpu.dot_dimension_numbers<[1], [0], [0], [1], [0, 0, 1, 1], [], []>} : vector<50x15xf32>, vector<15x200xf32>, vector<50x200xf32> -> vector<50x200xf32>
    %13 = vector.broadcast %11 : vector<50x1xf32> to vector<50x200xf32>
    %14 = arith.addf %12, %13 : vector<50x200xf32>
    %c72 = arith.constant 72 : index
    %c0_7 = arith.constant 0 : index
    %15 = vector.load %arg1[%c72, %c0_7] : memref<200x50xf32, #tpu.memory_space<vmem>>, vector<10x50xf32>
    %c176 = arith.constant 176 : index
    %c0_8 = arith.constant 0 : index
    %16 = vector.load %arg1[%c176, %c0_8] : memref<200x50xf32, #tpu.memory_space<vmem>>, vector<10x1xf32>
    %cst_9 = arith.constant dense<0.000000e+00> : vector<10x200xf32>
    %17 = tpu.matmul %15, %14, %cst_9 {dimension_numbers = #tpu.dot_dimension_numbers<[1], [0], [0], [1], [0, 0, 1, 1], [], []>} : vector<10x50xf32>, vector<50x200xf32>, vector<10x200xf32> -> vector<10x200xf32>
    %18 = vector.broadcast %16 : vector<10x1xf32> to vector<10x200xf32>
    %19 = arith.addf %17, %18 : vector<10x200xf32>
    %cst_10 = arith.constant 0.000000e+00 : f32
    %20 = vector.broadcast %cst_10 : f32 to vector<10x200xf32>
    %21 = arith.maximumf %19, %20 : vector<10x200xf32>
    %c88 = arith.constant 88 : index
    %c0_11 = arith.constant 0 : index
    %22 = vector.load %arg1[%c88, %c0_11] : memref<200x50xf32, #tpu.memory_space<vmem>>, vector<10x1xf32>
    %c192 = arith.constant 192 : index
    %c0_12 = arith.constant 0 : index
    %23 = vector.load %arg1[%c192, %c0_12] : memref<200x50xf32, #tpu.memory_space<vmem>>, vector<1x1xf32>
    %24 = vector.broadcast %22 : vector<10x1xf32> to vector<10x200xf32>
    %25 = arith.mulf %24, %21 : vector<10x200xf32>
    %cst_13 = arith.constant dense<0.000000e+00> : vector<200xf32>
    %26 = vector.multi_reduction <add>, %25, %cst_13 [0] : vector<10x200xf32> to vector<200xf32>
    %27 = vector.shape_cast %26 : vector<200xf32> to vector<1x200xf32>
    %28 = vector.broadcast %23 : vector<1x1xf32> to vector<1x200xf32>
    %29 = arith.addf %27, %28 : vector<1x200xf32>
    %c0_14 = arith.constant 0 : index
    %c0_15 = arith.constant 0 : index
    %30 = vector.load %arg2[%c0_14, %c0_15] : memref<1x200xf32, #tpu.memory_space<vmem>>, vector<1x200xf32>
    tpu.vector_store %arg2[%c0_14, %c0_15], %29 {strides = array<i32>} : memref<1x200xf32, #tpu.memory_space<vmem>>, vector<1x200xf32>,
    return
  }
}

</mosaic_0001>

<bundles_post_ra>
// kernel: tpu_custom_call.1
= control target key start
LH: loop header
LB: loop body
LE: loop exit
PB: predicated region body
PF: predicated region fallthrough
CT: control target
= control target key end

     0   :  { %v496_v2 = vmov 0   ;;  %s632_s0 = inlined_call_operand.vmem [shape: f32[1,200], index: 0, kind: input, shape index: {}]   ;;  %s633_s1 = inlined_call_operand.vmem [shape: f32[200,50], index: 1, kind: input, shape index: {}]   ;;  %s634_s2 = inlined_call_operand.hbm [shape: f32[1,200], index: 2, kind: output, shape index: {}]  }
   0x1   :  { %v15_v0 = vld [vmem:[%s633_s1 + $0x68] sm:$0xff]  ;;  %v13_v1 = vld [vmem:[%s633_s1] sm:$0xff]  ;;  %471 = vset.pattern.permute.xlu1 %v496_v2  ;;  %470 = vset.pattern.permute.xlu0 %v496_v2  ;;  %v16_v3 = vld [vmem:[%s633_s1 + $0x70] sm:$0x7f] }
   0x2   :  { %44 = vperm.xlu1 %471, %v15_v0   ;;  %19 = vperm.xlu0 %470, %v13_v1   ;;  %v14_v4 = vld [vmem:[%s633_s1 + $0x8] sm:$0x7f] }
   0x6   :  { %49 = vperm.xlu1 %471, %v16_v3   ;;  %24 = vperm.xlu0 %470, %v14_v4  }
   0x7   :  { %7 = vsyncpa [#allocation3], 0  ;;  %v68_v5 = vld [vmem:[%s633_s1 + $0x80] sm:$0xff]  ;;  %v67_v6 = vld [vmem:[%s633_s1 + $0x78] sm:$0xff]  ;;  %v497_v11 = vmov 0.0   ;;  %v28_v18 = vlaneseq  ;;  %vm131_vm0 = vcmask 1046528  }
   0x8   :  { %v70_v7 = vld [vmem:[%s633_s1 + $0x90] sm:$0xff]  ;;  %v69_v8 = vld [vmem:[%s633_s1 + $0x88] sm:$0xff]  ;;  %v72_v9 = vld [vmem:[%s633_s1 + $0xa0] sm:$0xff]  ;;  %202 = vmatprep.mubr.f32.mxu0 %v497_v11  ;;  %337 = vmatprep.mubr.f32.mxu1 %v497_v11  ;;  %vm498_vm1 = vmmov 1   ;;  %vm109_vm3 = vcmask 121856   ;;  %vm266_vm4 = vcmask 1041408  }
   0x9   :  { %v71_v10 = vld [vmem:[%s633_s1 + $0x98] sm:$0xff]  ;;  %v247_v12 = vld [vmem:[%s633_s1 + $0xb0] sm:$0xff]  ;;  %v73_v13 = vld [vmem:[%s633_s1 + $0xa8] sm:$0x3]  ;;  %v567_v19 = vshrl.u32 %v28_v18, 7  ;;  %vm259_vm5 = vcmask 408576  }
   0xa   :  { %81 = vperm.xlu1 %471, %v68_v5   ;;  %76 = vperm.xlu0 %470, %v67_v6   ;;  %v354_v14 = vld [vmem:[%s633_s1 + $0x58] sm:$0xff]  ;;  %v356_v16 = vld [vmem:[%s633_s1 + $0xc0] sm:$0x1]  ;;  %vm448_vm2 = vmpackc.low %vm131_vm0, %vm498_vm1  ;;  %vm379_vm6 = vcmask 588800   ;;  %vm381_vm7 = vcmask 582656   ;;  %vm417_vm8 = vcmp.lt.s32.totalorder %v28_v18, 200 }
   0xb   :  { %v248_v15 = vld [vmem:[%s633_s1 + $0xb8] sm:$0x3]  ;;  %v355_v17 = vld [vmem:[%s633_s1 + $0x60] sm:$0x3]  ;;  %v30_v20 = vsub.s32 0, %v567_v19  ;;  %v34_v21 = vsub.s32 1, %v567_v19 }
   0xc   :  { %v12_v22 = vld [vmem:[%s632_s0] sm:$0x3]  ;;  %v60_v43 = vld [vmem:[%s633_s1 + $0x10] sm:$0xff]  ;;  %v61_v44 = vld [vmem:[%s633_s1 + $0x18] sm:$0xff] }
   0xd   :  { %v31_v23 = vrot.slane %v12_v22, %v30_v20  ;;  %v35_v24 = vrot.slane %v12_v22, %v34_v21  ;;  %v62_v45 = vld [vmem:[%s633_s1 + $0x20] sm:$0xff]  ;;  %v63_v46 = vld [vmem:[%s633_s1 + $0x28] sm:$0xff]  ;;  %v64_v47 = vld [vmem:[%s633_s1 + $0x30] sm:$0xff] }
   0xe   :  { %91 = vperm.xlu1 %471, %v70_v7   ;;  %86 = vperm.xlu0 %470, %v69_v8   ;;  %v65_v48 = vld [vmem:[%s633_s1 + $0x38] sm:$0xff]  ;;  %v66_v49 = vld [vmem:[%s633_s1 + $0x40] sm:$0x3] }
  0x12   :  { %101 = vperm.xlu1 %471, %v72_v9   ;;  %96 = vperm.xlu0 %470, %v71_v10  }
  0x16   :  { %251 = vperm.xlu1 %471, %v247_v12   ;;  %106 = vperm.xlu0 %470, %v73_v13  }
  0x1a   :  { %359 = vperm.xlu1 %471, %v354_v14   ;;  %256 = vperm.xlu0 %470, %v248_v15  }
  0x1e   :  { %392 = vperm.xlu1 %471, %v356_v16   ;;  %364 = vperm.xlu0 %470, %v355_v17  }
  0x81   :  { %v45_v25 = vpop.permute.xlu1 %44  ;;  %v20_v26 = vpop.permute.xlu0 %19 }
  0x82   :  { %v38_v27 = vmul.f32 %v31_v23, %v20_v26  ;;  %v39_v28 = vmul.f32 %v35_v24, %v20_v26 }
  0x84   :  { %v52_v30 = vadd.f32 %v45_v25, %v38_v27  ;;  %v53_v31 = vadd.f32 %v45_v25, %v39_v28 }
  0x85   :  { %v25_v29 = vpop.permute.xlu0 %24  ;;  %v50_v34 = vpop.permute.xlu1 %49 }
  0x86   :  { %v40_v32 = vmul.f32 %v31_v23, %v25_v29  ;;  %v41_v33 = vmul.f32 %v35_v24, %v25_v29  ;;  %v56_v37 = vmax.f32 %v52_v30, 0.0  ;;  %v57_v39 = vmax.f32 %v53_v31, 0.0  ;;  %v245_v30 = vld [vmem:[%s633_s1 + $0x48] sm:$0xff]  ;;  %v246_v31 = vld [vmem:[%s633_s1 + $0x50] sm:$0x3]  ;;  %s500_s1 = smov [#allocation2]  }
  0x87   :  { %s426_s4 = sshll.u32 %s500_s1, 4  ;;  %s427_s4 = int_to_ptr.vmem [resolvable:$true] %s426_s4 }
  0x88   :  { %v54_v35 = vadd.f32 %v50_v34, %v40_v32  ;;  %v55_v36 = vadd.f32 %v50_v34, %v41_v33  ;;  %s472_s5 = scalar_lea.vmem %s427_s4, 32  ;;  %p477_p1 = scmp.lt.s32.totalorder %s427_s4, %s427_s4 }
  0x89   :  { %v82_v52 = vpop.permute.xlu1 %81  ;;  %v77_v53 = vpop.permute.xlu0 %76  ;;  %p473_p0 = scmp.ne.s32.totalorder %s427_s4, %s472_s5  ;;  %p478_p2 = scmp.lt.s32.totalorder %s472_s5, %s472_s5 }
  0x8a   :  { %v58_v38 = vmax.f32 %v54_v35, 0.0  ;;  %v59_v40 = vmax.f32 %v55_v36, 0.0 }
  0x8b   :  { %p479_p3 = por %p478_p2, %p477_p1 }
  0x8c   :  { %v447_v41 = vpack.c.bf16 %v59_v40, %v57_v39  ;;  %v450_v42 = vpack.c.bf16 %v58_v38, %v56_v37 }
  0x8d   :  { %v92_v0 = vpop.permute.xlu1 %91  ;;  %v87_v1 = vpop.permute.xlu0 %86  ;;  %p480_p4 = pnand %p479_p3, %p473_p0 }
  0x8e   :  { %449 = vmatprep.subr.msk.bf16.mxu0 %vm448_vm2, %v447_v41 }
  0x8f   :  { %452 = vmatpush1.bf16.msk.msra.mxu0 %vm448_vm2, %v450_v42 }
  0x91   :  { %v97_v13 = vpop.permute.xlu0 %96  ;;  %v102_v14 = vpop.permute.xlu1 %101 }
  0x92   :  { %436 = vmatmul.mubr.msk.f32.vlgmr.msra.gmra.mrb[0].mxu0 %vm109_vm3, %v60_v43 }
  0x93   :  { %208 = vmatprep.mubr.f32.mxu0 %v497_v11 }
  0x95   :  { %v107_v26 = vpop.permute.xlu0 %106  ;;  %v252_v33 = vpop.permute.xlu1 %251 }
  0x96   :  { %437 = vmatmul.mubr.msk.f32.gmra.mrb[2].mxu0 %vm109_vm3, %v61_v44 }
  0x97   :  { %214 = vmatprep.mubr.f32.mxu0 %v497_v11 }
  0x99   :  { %v257_v35 = vpop.permute.xlu0 %256  ;;  %v360_v44 = vpop.permute.xlu1 %359 }
  0x9a   :  { %438 = vmatmul.mubr.msk.f32.gmra.mrb[4].mxu0 %vm109_vm3, %v62_v45 }
  0x9b   :  { %220 = vmatprep.mubr.f32.mxu0 %v497_v11 }
  0x9e   :  { %439 = vmatmul.mubr.msk.f32.gmra.mrb[6].mxu0 %vm109_vm3, %v63_v46 }
  0x9f   :  { %226 = vmatprep.mubr.f32.mxu0 %v497_v11 }
  0xa2   :  { %440 = vmatmul.mubr.msk.f32.gmra.mrb[8].mxu0 %vm109_vm3, %v64_v47 }
  0xa3   :  { %232 = vmatprep.mubr.f32.mxu0 %v497_v11 }
  0xa6   :  { %441 = vmatmul.mubr.msk.f32.gmra.mrb[10].mxu0 %vm109_vm3, %v65_v48 }
  0xa7   :  { %238 = vmatprep.mubr.f32.mxu0 %v497_v11 }
  0xaa   :  { %442 = vmatmul.mubr.msk.f32.gmra.mrb[12].mxu0 %vm109_vm3, %v66_v49 }
 0x165   :  { %v204_v50 = vpop.f32.mrb[0].mxu0 }
 0x166   :  { %v206_v51 = vpop.f32.mrb[1].mxu0  ;;  %v205_v55 = vadd.f32 %v204_v50, %v77_v53 }
 0x167   :  { %v207_v58 = vadd.f32 %v206_v51, %v77_v53 }
 0x169   :  { %v210_v54 = vpop.f32.mrb[2].mxu0 }
 0x16a   :  { %v211_v56 = vadd.f32 %v210_v54, %v82_v52  ;;  %v212_v57 = vpop.f32.mrb[3].mxu0 }
 0x16b   :  { %v213_v59 = vadd.f32 %v212_v57, %v82_v52 }
 0x16c   :  { %v455_v60 = vpack.c.bf16 %v211_v56, %v205_v55 }
 0x16d   :  { %v216_v61 = vpop.f32.mrb[4].mxu0  ;;  %v453_v62 = vpack.c.bf16 %v213_v59, %v207_v58 }
 0x16e   :  { %v218_v63 = vpop.f32.mrb[5].mxu0  ;;  %v217_v3 = vadd.f32 %v216_v61, %v87_v1 }
 0x16f   :  { %454 = vmatprep.subr.bf16.mxu1 %v453_v62  ;;  %v219_v6 = vadd.f32 %v218_v63, %v87_v1  ;;  %v499_v62 = vmov 1966171168  }
 0x170   :  { %456 = vmatpush1.bf16.msra.mxu1 %v455_v60  ;;  %v401_v63 = vunpack.c.l.s4 %v499_v62 }
 0x171   :  { %v222_v2 = vpop.f32.mrb[6].mxu0 }
 0x172   :  { %v223_v4 = vadd.f32 %v222_v2, %v92_v0  ;;  %v224_v5 = vpop.f32.mrb[7].mxu0 }
 0x173   :  { %v225_v7 = vadd.f32 %v224_v5, %v92_v0 }
 0x174   :  { %v459_v8 = vpack.c.bf16 %v223_v4, %v217_v3  ;;  %v402_v4 = vunpack.c.0.s8 %v401_v63 }
 0x175   :  { %v457_v9 = vpack.c.bf16 %v225_v7, %v219_v6  ;;  %v228_v10 = vpop.f32.mrb[8].mxu0  ;;  %v393_v6 = vpop.permute.xlu1 %392 }
 0x176   :  { %v230_v12 = vpop.f32.mrb[9].mxu0  ;;  %v229_v16 = vadd.f32 %v228_v10, %v97_v13  ;;  %v405_v10 = vsub.s32 %v402_v4, %v567_v19 }
 0x177   :  { %458 = vmatprep.subr.bf16.mxu1 %v457_v9  ;;  %v231_v21 = vadd.f32 %v230_v12, %v97_v13 }
 0x178   :  { %460 = vmatpush1.bf16.msra.mxu1 %v459_v8 }
 0x179   :  { %v234_v15 = vpop.f32.mrb[10].mxu0 }
 0x17a   :  { %v235_v17 = vadd.f32 %v234_v15, %v102_v14  ;;  %v236_v20 = vpop.f32.mrb[11].mxu0 }
 0x17b   :  { %v237_v22 = vadd.f32 %v236_v20, %v102_v14 }
 0x17c   :  { %v463_v23 = vpack.c.bf16 %v235_v17, %v229_v16 }
 0x17d   :  { %v461_v24 = vpack.c.bf16 %v237_v22, %v231_v21  ;;  %v240_v25 = vpop.f32.mrb[12].mxu0 }
 0x17e   :  { %v242_v27 = vpop.f32.mrb[13].mxu0  ;;  %v241_v29 = vadd.f32 %v240_v25, %v107_v26 }
 0x17f   :  { %v243_v28 = vadd.f32 %v242_v27, %v107_v26  ;;  %462 = vmatprep.subr.bf16.mxu1 %v461_v24 }
 0x180   :  { %464 = vmatpush1.bf16.msra.mxu1 %v463_v23 }
 0x181   :  { %443 = vmatprep.subr.msk.mxu1 %vm266_vm4, %v243_v28 }
 0x184   :  { %444 = vmatpush1.msk.msra.mxu1 %vm266_vm4, %v241_v29 }
 0x185   :  { %445 = vmatmul.mubr.msk.f32.vlgmr.msra.gmra.mrb[0].mxu1 %vm259_vm5, %v245_v30 }
 0x186   :  { %343 = vmatprep.mubr.f32.mxu1 %v497_v11  ;;  %v365_v11 = vpop.permute.xlu0 %364 }
 0x189   :  { %446 = vmatmul.mubr.msk.f32.gmra.mrb[2].mxu1 %vm259_vm5, %v246_v31 }
 0x258   :  { %v339_v32 = vpop.f32.mrb[0].mxu1 }
 0x259   :  { %v341_v34 = vpop.f32.mrb[1].mxu1  ;;  %v340_v36 = vadd.f32 %v339_v32, %v252_v33 }
 0x25a   :  { %v342_v37 = vadd.f32 %v341_v34, %v252_v33 }
 0x25b   :  { %v350_v42 = vmax.f32 %v340_v36, 0.0 }
 0x25c   :  { %v351_v38 = vmax.f32 %v342_v37, 0.0  ;;  %v345_v39 = vpop.f32.mrb[2].mxu1 }
 0x25d   :  { %v346_v40 = vadd.f32 %v345_v39, %v257_v35  ;;  %v347_v41 = vpop.f32.mrb[3].mxu1  ;;  %v367_v49 = vmul.f32 %v360_v44, %v350_v42 }
 0x25e   :  { %v348_v43 = vadd.f32 %v347_v41, %v257_v35  ;;  %v368_v46 = vmul.f32 %v360_v44, %v351_v38 }
 0x25f   :  { %v352_v45 = vmax.f32 %v346_v40, 0.0 }
 0x260   :  { %v353_v47 = vmax.f32 %v348_v43, 0.0  ;;  %v380_v52 = vsel %vm379_vm6, %v368_v46, 0.0 }
 0x261   :  { %v369_v48 = vmul.f32 %v365_v11, %v352_v45 }
 0x262   :  { %v370_v50 = vmul.f32 %v365_v11, %v353_v47 }
 0x263   :  { %v371_v51 = vsel %vm266_vm4, %v369_v48, 0.0 }
 0x264   :  { %v372_v53 = vadd.f32 %v371_v51, %v367_v49  ;;  %v382_v54 = vsel %vm381_vm7, %v370_v50, 0.0 }
 0x265   :  { %v383_v55 = vadd.f32 %v382_v54, %v380_v52 }
 0x266   :  { %v373_v56 = vrot.slane %v372_v53, 4 }
 0x267   :  { %v384_v57 = vrot.slane %v383_v55, 4 }
 0x268   :  { %v374_v58 = vadd.f32 %v373_v56, %v372_v53 }
 0x269   :  { %v385_v59 = vadd.f32 %v384_v57, %v383_v55 }
 0x26a   :  { %v375_v60 = vrot.slane %v374_v58, 2 }
 0x26b   :  { %v386_v61 = vrot.slane %v385_v59, 2 }
 0x26c   :  { %v376_v0 = vadd.f32 %v375_v60, %v374_v58 }
 0x26d   :  { %v387_v1 = vadd.f32 %v386_v61, %v385_v59 }
 0x26e   :  { %v377_v2 = vrot.slane %v376_v0, 1 }
 0x26f   :  { %v388_v3 = vrot.slane %v387_v1, 1 }
 0x270   :  { %v378_v5 = vadd.f32 %v377_v2, %v376_v0 }
 0x271   :  { %v389_v7 = vadd.f32 %v388_v3, %v387_v1 }
 0x272   :  { %v395_v8 = vadd.f32 %v393_v6, %v378_v5 }
 0x273   :  { %v396_v9 = vadd.f32 %v393_v6, %v389_v7 }
 0x275   :  { %v399_v12 = vcombine.low %v395_v8, %v396_v9 }
 0x277   :  { %v406_v13 = vrot.slane %v399_v12, %v405_v10 }
 0x279   :  { %v413_v14 = vrot.slane %v406_v13, %v405_v10 }
 0x27b   :  { %419 = vst.msk [vmem:[#allocation2] sm:$0x3] %vm417_vm8, %v413_v14 }
 0x27c   :  { %483 = shalt.err (!%p480_p4)
}
 0x27d   :  { %s484_s8 = scalar_lea.hbm %s634_s2, 32 }
 0x27e   :  { %p485_p5 = scmp.ne.s32.totalorder %s634_s2, %s484_s8  ;;  %p488_p6 = scmp.lt.u32.totalorder %s484_s8, %s634_s2 }
 0x280   :  { %p490_p7 = pnand %p488_p6, %p485_p5 }
 0x282   :  { %493 = shalt.err (!%p490_p7)
}
 0x283   :  { %429 = dma.vmem_to_hbm [thread:$0]  %s427_s4, 32, %s634_s2, [#allocation3]  }
 0x284   :  { %494 = dma.done.wait [#allocation3], 32  }
 0x285   :  { %495 = vsyncadd [#allocation3], 4294967264 }
 0x286   :  { %433 = vsyncpa [#allocation3], 1 }

</bundles_post_ra>
